<compile_context>
chip_gen: v7x
topology: tpu7x:2x2x1
jax: 0.10.0
libtpu: 0.0.40
codegen_flags: <defaults>
</compile_context>

<pallas_src>
import jax
import jax.numpy as jnp
from jax.experimental import pallas as pl
from jax.experimental.pallas import tpu as pltpu


def _round_up(x, m):
    return ((x + m - 1) // m) * m


def _mlp_kernel(x_ref, *refs):
    """Fused MLP forward for one batch tile.

    refs = (w0, b0, w1, b1, ..., o_ref).
    Weights are (in, out), lane-padded to 128, in the matmul dtype (bf16 or f32);
    biases are f32 (1, out). All weights/biases use a constant index_map so they
    are resident in VMEM across the whole grid.
    """
    o_ref = refs[-1]
    wb = refs[:-1]
    n_linear = len(wb) // 2

    h = x_ref[...]                                  # f32 input tile (cast happens here, not in the wrapper)
    for li in range(n_linear):
        w = wb[2 * li][...]
        b = wb[2 * li + 1][...]                     # f32
        acc = jnp.dot(h.astype(w.dtype), w,
                      preferred_element_type=jnp.float32) + b
        if li < n_linear - 1:
            acc = jnp.maximum(acc, 0.0)             # ReLU on the f32 accumulator
        # nn.Dropout(0.3): identity at inference time.
        h = acc
    # Store only the real head column(s): narrow (tile_b, out_dim) HBM writeback.
    o_ref[...] = h[:, :o_ref.shape[1]].astype(o_ref.dtype)


def prepare_params(params, matmul_dtype=jnp.bfloat16):
    """One-time weight/bias padding + casting, hoisted out of the forward hot path.

    params: list of (W, b); W: [in, out] (transposed vs PyTorch), b: [out] or [1, out]
    Returns (flat_padded_params, out_dim). Every layer's output width is zero-padded
    to a multiple of 128 lanes (VMEM-side only); zero weight rows/cols + zero bias
    keep the padded lanes exactly zero through bias-add/ReLU.
    """
    matmul_dtype = jnp.dtype(matmul_dtype)
    flat = []
    prev_pad = params[0][0].shape[0]                # input_size (x is NOT padded in HBM)
    for w, b in params:
        f_in, f_out = w.shape
        out_pad = _round_up(f_out, 128)
        w_p = jnp.zeros((prev_pad, out_pad), matmul_dtype)
        w_p = w_p.at[:f_in, :f_out].set(w.astype(matmul_dtype))
        b_p = jnp.zeros((1, out_pad), jnp.float32)
        b_p = b_p.at[:, :f_out].set(jnp.reshape(b, (1, f_out)).astype(jnp.float32))
        flat.extend([w_p, b_p])
        prev_pad = out_pad
    out_dim = params[-1][0].shape[1]
    return tuple(flat), out_dim


def demand_mlp_forward(x, prepared, *, tile_b=2048):
    """Run the fused MLP Pallas kernel.

    x:        [B, input_size] float32 (passed through untouched -- no pad / no cast)
    prepared: output of prepare_params()
    returns   [B, 1] float32
    """
    flat, out_dim = prepared
    B, in_dim = x.shape

    # Batch tiling: large, sublane-friendly tiles; no HBM padding of x.
    tile_b = max(16, min(int(tile_b), _round_up(B, 16)))
    tile_b = _round_up(tile_b, 16)
    # v7x megacore: ensure >= 2 grid steps when the batch allows (>= 512 rows/tile),
    # so dimension_semantics=("parallel",) can shard steps across both TensorCores.
    if B >= 1024:
        tile_b = min(tile_b, max(512, _round_up(pl.cdiv(B, 2), 16)))

    grid = pl.cdiv(B, tile_b)                       # ragged tail: OOB rows masked on write

    in_specs = [pl.BlockSpec((tile_b, in_dim), lambda i: (i, 0))]
    for arr in flat:
        # Same block for every grid step -> resident in VMEM, fetched once.
        in_specs.append(pl.BlockSpec(arr.shape, lambda i: (0, 0)))

    # VMEM budget: double-buffered x/out tiles + resident params + widest f32
    # intermediate activation + headroom, capped at 48 MiB (< v7x's 64 MiB physical).
    max_out_pad = max(w.shape[1] for w in flat[0::2])
    est = 2 * tile_b * in_dim * x.dtype.itemsize                    # input double buffer
    est += 2 * tile_b * out_dim * 4                                 # (narrow) output double buffer
    est += 2 * sum(int(a.size) * a.dtype.itemsize for a in flat)    # resident params
    est += 2 * tile_b * max_out_pad * 4                             # widest f32 activation
    vmem_limit = int(min(48 * 1024 * 1024, max(32 * 1024 * 1024, 2 * est)))

    out = pl.pallas_call(
        _mlp_kernel,
        out_shape=jax.ShapeDtypeStruct((B, out_dim), jnp.float32),
        grid=(grid,),
        in_specs=in_specs,
        out_specs=pl.BlockSpec((tile_b, out_dim), lambda i: (i, 0)),
        compiler_params=pltpu.CompilerParams(
            dimension_semantics=("parallel",),   # lets v7x shard grid steps across both TCs
            vmem_limit_bytes=vmem_limit,
        ),
    )(x, *flat)
    return out


def init_params(key, input_size, hidden_size=128, num_layers=3):
    """Deterministic PyTorch-Linear-style init: U(-1/sqrt(fan_in), 1/sqrt(fan_in))."""
    dims = [input_size, hidden_size]
    dims += [hidden_size] * (num_layers - 2)
    dims += [hidden_size // 2, 1]

    params = []
    for i in range(len(dims) - 1):
        fan_in, fan_out = dims[i], dims[i + 1]
        key, kw, kb = jax.random.split(key, 3)
        bound = 1.0 / (fan_in ** 0.5)
        w = jax.random.uniform(kw, (fan_in, fan_out), jnp.float32, -bound, bound)
        b = jax.random.uniform(kb, (1, fan_out), jnp.float32, -bound, bound)
        params.append((w, b))
    return params


def reference_forward(x, params):
    """Plain-JAX f32 reference of the same forward pass."""
    h = x
    for li, (w, b) in enumerate(params):
        h = h @ w + b
        if li < len(params) - 1:
            h = jnp.maximum(h, 0.0)
    return h


if __name__ == "__main__":
    key = jax.random.PRNGKey(0)
    k_x, k_p = jax.random.split(key)

    # Small, module-consistent shapes: batch=64, input_size=16, hidden=32, num_layers=3.
    batch, input_size, hidden_size, num_layers = 64, 16, 32, 3
    x = jax.random.normal(k_x, (batch, input_size), jnp.float32)
    params = init_params(k_p, input_size, hidden_size, num_layers)

    ref = reference_forward(x, params)

    # One-time parameter preparation (hoisted out of the per-call hot path).
    prep_f32 = prepare_params(params, matmul_dtype=jnp.float32)
    prep_bf16 = prepare_params(params, matmul_dtype=jnp.bfloat16)

    # f32 matmul path: strict correctness check.
    out_f32 = jax.block_until_ready(demand_mlp_forward(x, prep_f32))
    assert out_f32.shape == (batch, 1)
    assert jnp.allclose(out_f32, ref, atol=1e-4, rtol=1e-4), "f32 kernel mismatch vs reference"

    # Default bf16-operand / f32-accumulate path (fast MXU path on v6e/v7x): relaxed check.
    out_bf16 = jax.block_until_ready(demand_mlp_forward(x, prep_bf16))
    assert out_bf16.shape == (batch, 1)
    assert jnp.allclose(out_bf16, ref, atol=5e-2, rtol=5e-2), "bf16 kernel mismatch vs reference"

    # Ragged batch (B not a multiple of the tile) exercises the no-jnp.pad path:
    # the tail block's out-of-bounds rows are masked on write.
    x_ragged = x[:50]
    out_ragged = jax.block_until_ready(demand_mlp_forward(x_ragged, prep_f32))
    assert out_ragged.shape == (50, 1)
    assert jnp.allclose(out_ragged, ref[:50], atol=1e-4, rtol=1e-4), "ragged-batch mismatch"

    print("KERNEL_OK")
</pallas_src>

<mosaic_0001>
module attributes {stable_mosaic.version = 11 : i64} {
  func.func @_mlp_kernel(%arg0: i32, %arg1: memref<64x16xf32, #tpu.memory_space<vmem>>, %arg2: memref<16x128xf32, #tpu.memory_space<vmem>>, %arg3: memref<1x128xf32, #tpu.memory_space<vmem>>, %arg4: memref<128x128xf32, #tpu.memory_space<vmem>>, %arg5: memref<1x128xf32, #tpu.memory_space<vmem>>, %arg6: memref<128x128xf32, #tpu.memory_space<vmem>>, %arg7: memref<1x128xf32, #tpu.memory_space<vmem>>, %arg8: memref<128x128xf32, #tpu.memory_space<vmem>>, %arg9: memref<1x128xf32, #tpu.memory_space<vmem>>, %arg10: memref<64x1xf32, #tpu.memory_space<vmem>>) attributes {dimension_semantics = [#tpu.dimension_semantics<parallel>], iteration_bounds = array<i64: 1>, scalar_prefetch = 0 : i64, scratch_operands = 0 : i64, tpu.core_type = #tpu.core_type<tc>, window_params = [{transform_indices = @transform_0, window_bounds = array<i64: 64, 16>}, {pipeline_mode = #tpu.pipeline_mode<synchronous>, transform_indices = @transform_1, window_bounds = array<i64: 16, 128>}, {pipeline_mode = #tpu.pipeline_mode<synchronous>, transform_indices = @transform_2, window_bounds = array<i64: 1, 128>}, {pipeline_mode = #tpu.pipeline_mode<synchronous>, transform_indices = @transform_3, window_bounds = array<i64: 128, 128>}, {pipeline_mode = #tpu.pipeline_mode<synchronous>, transform_indices = @transform_4, window_bounds = array<i64: 1, 128>}, {pipeline_mode = #tpu.pipeline_mode<synchronous>, transform_indices = @transform_5, window_bounds = array<i64: 128, 128>}, {pipeline_mode = #tpu.pipeline_mode<synchronous>, transform_indices = @transform_6, window_bounds = array<i64: 1, 128>}, {pipeline_mode = #tpu.pipeline_mode<synchronous>, transform_indices = @transform_7, window_bounds = array<i64: 128, 128>}, {pipeline_mode = #tpu.pipeline_mode<synchronous>, transform_indices = @transform_8, window_bounds = array<i64: 1, 128>}, {transform_indices = @transform_9, window_bounds = array<i64: 64, 1>}]} {
    %c0 = arith.constant 0 : index
    %c0_0 = arith.constant 0 : index
    %0 = vector.load %arg1[%c0, %c0_0] : memref<64x16xf32, #tpu.memory_space<vmem>>, vector<64x16xf32>
    %c0_1 = arith.constant 0 : index
    %c0_2 = arith.constant 0 : index
    %1 = vector.load %arg2[%c0_1, %c0_2] : memref<16x128xf32, #tpu.memory_space<vmem>>, vector<16x128xf32>
    %c0_3 = arith.constant 0 : index
    %c0_4 = arith.constant 0 : index
    %2 = vector.load %arg3[%c0_3, %c0_4] : memref<1x128xf32, #tpu.memory_space<vmem>>, vector<1x128xf32>
    %cst = arith.constant dense<0.000000e+00> : vector<64x128xf32>
    %3 = tpu.matmul %0, %1, %cst {dimension_numbers = #tpu.dot_dimension_numbers<[1], [0], [0], [1], [0, 0, 1, 1], [], []>} : vector<64x16xf32>, vector<16x128xf32>, vector<64x128xf32> -> vector<64x128xf32>
    %4 = vector.broadcast %2 : vector<1x128xf32> to vector<64x128xf32>
    %5 = arith.addf %3, %4 : vector<64x128xf32>
    %cst_5 = arith.constant 0.000000e+00 : f32
    %6 = vector.broadcast %cst_5 : f32 to vector<64x128xf32>
    %7 = arith.maximumf %5, %6 : vector<64x128xf32>
    %c0_6 = arith.constant 0 : index
    %c0_7 = arith.constant 0 : index
    %8 = vector.load %arg4[%c0_6, %c0_7] : memref<128x128xf32, #tpu.memory_space<vmem>>, vector<128x128xf32>
    %c0_8 = arith.constant 0 : index
    %c0_9 = arith.constant 0 : index
    %9 = vector.load %arg5[%c0_8, %c0_9] : memref<1x128xf32, #tpu.memory_space<vmem>>, vector<1x128xf32>
    %cst_10 = arith.constant dense<0.000000e+00> : vector<64x128xf32>
    %10 = tpu.matmul %7, %8, %cst_10 {dimension_numbers = #tpu.dot_dimension_numbers<[1], [0], [0], [1], [0, 0, 1, 1], [], []>} : vector<64x128xf32>, vector<128x128xf32>, vector<64x128xf32> -> vector<64x128xf32>
    %11 = vector.broadcast %9 : vector<1x128xf32> to vector<64x128xf32>
    %12 = arith.addf %10, %11 : vector<64x128xf32>
    %cst_11 = arith.constant 0.000000e+00 : f32
    %13 = vector.broadcast %cst_11 : f32 to vector<64x128xf32>
    %14 = arith.maximumf %12, %13 : vector<64x128xf32>
    %c0_12 = arith.constant 0 : index
    %c0_13 = arith.constant 0 : index
    %15 = vector.load %arg6[%c0_12, %c0_13] : memref<128x128xf32, #tpu.memory_space<vmem>>, vector<128x128xf32>
    %c0_14 = arith.constant 0 : index
    %c0_15 = arith.constant 0 : index
    %16 = vector.load %arg7[%c0_14, %c0_15] : memref<1x128xf32, #tpu.memory_space<vmem>>, vector<1x128xf32>
    %cst_16 = arith.constant dense<0.000000e+00> : vector<64x128xf32>
    %17 = tpu.matmul %14, %15, %cst_16 {dimension_numbers = #tpu.dot_dimension_numbers<[1], [0], [0], [1], [0, 0, 1, 1], [], []>} : vector<64x128xf32>, vector<128x128xf32>, vector<64x128xf32> -> vector<64x128xf32>
    %18 = vector.broadcast %16 : vector<1x128xf32> to vector<64x128xf32>
    %19 = arith.addf %17, %18 : vector<64x128xf32>
    %cst_17 = arith.constant 0.000000e+00 : f32
    %20 = vector.broadcast %cst_17 : f32 to vector<64x128xf32>
    %21 = arith.maximumf %19, %20 : vector<64x128xf32>
    %c0_18 = arith.constant 0 : index
    %c0_19 = arith.constant 0 : index
    %22 = vector.load %arg8[%c0_18, %c0_19] : memref<128x128xf32, #tpu.memory_space<vmem>>, vector<128x128xf32>
    %c0_20 = arith.constant 0 : index
    %c0_21 = arith.constant 0 : index
    %23 = vector.load %arg9[%c0_20, %c0_21] : memref<1x128xf32, #tpu.memory_space<vmem>>, vector<1x128xf32>
    %cst_22 = arith.constant dense<0.000000e+00> : vector<64x128xf32>
    %24 = tpu.matmul %21, %22, %cst_22 {dimension_numbers = #tpu.dot_dimension_numbers<[1], [0], [0], [1], [0, 0, 1, 1], [], []>} : vector<64x128xf32>, vector<128x128xf32>, vector<64x128xf32> -> vector<64x128xf32>
    %25 = vector.broadcast %23 : vector<1x128xf32> to vector<64x128xf32>
    %26 = arith.addf %24, %25 : vector<64x128xf32>
    %27 = vector.extract_strided_slice %26 {offsets = [0, 0], sizes = [64, 1], strides = [1, 1]} : vector<64x128xf32> to vector<64x1xf32>
    %c0_23 = arith.constant 0 : index
    %c0_24 = arith.constant 0 : index
    %28 = vector.load %arg10[%c0_23, %c0_24] : memref<64x1xf32, #tpu.memory_space<vmem>>, vector<64x1xf32>
    tpu.vector_store %arg10[%c0_23, %c0_24], %27 {strides = array<i32>} : memref<64x1xf32, #tpu.memory_space<vmem>>, vector<64x1xf32>,
    return
  }
  func.func @transform_0(%arg0: i32) -> (i32, i32) {
    %c0_i32 = arith.constant 0 : i32
    %c0_i32_0 = arith.constant 0 : i32
    return %arg0, %c0_i32 : i32, i32
  }
  func.func @transform_1(%arg0: i32) -> (i32, i32) {
    %c0_i32 = arith.constant 0 : i32
    %c0_i32_0 = arith.constant 0 : i32
    %c0_i32_1 = arith.constant 0 : i32
    return %c0_i32, %c0_i32_0 : i32, i32
  }
  func.func @transform_2(%arg0: i32) -> (i32, i32) {
    %c0_i32 = arith.constant 0 : i32
    %c0_i32_0 = arith.constant 0 : i32
    %c0_i32_1 = arith.constant 0 : i32
    return %c0_i32, %c0_i32_0 : i32, i32
  }
  func.func @transform_3(%arg0: i32) -> (i32, i32) {
    %c0_i32 = arith.constant 0 : i32
    %c0_i32_0 = arith.constant 0 : i32
    %c0_i32_1 = arith.constant 0 : i32
    return %c0_i32, %c0_i32_0 : i32, i32
  }
  func.func @transform_4(%arg0: i32) -> (i32, i32) {
    %c0_i32 = arith.constant 0 : i32
    %c0_i32_0 = arith.constant 0 : i32
    %c0_i32_1 = arith.constant 0 : i32
    return %c0_i32, %c0_i32_0 : i32, i32
  }
  func.func @transform_5(%arg0: i32) -> (i32, i32) {
    %c0_i32 = arith.constant 0 : i32
    %c0_i32_0 = arith.constant 0 : i32
    %c0_i32_1 = arith.constant 0 : i32
    return %c0_i32, %c0_i32_0 : i32, i32
  }
  func.func @transform_6(%arg0: i32) -> (i32, i32) {
    %c0_i32 = arith.constant 0 : i32
    %c0_i32_0 = arith.constant 0 : i32
    %c0_i32_1 = arith.constant 0 : i32
    return %c0_i32, %c0_i32_0 : i32, i32
  }
  func.func @transform_7(%arg0: i32) -> (i32, i32) {
    %c0_i32 = arith.constant 0 : i32
    %c0_i32_0 = arith.constant 0 : i32
    %c0_i32_1 = arith.constant 0 : i32
    return %c0_i32, %c0_i32_0 : i32, i32
  }
  func.func @transform_8(%arg0: i32) -> (i32, i32) {
    %c0_i32 = arith.constant 0 : i32
    %c0_i32_0 = arith.constant 0 : i32
    %c0_i32_1 = arith.constant 0 : i32
    return %c0_i32, %c0_i32_0 : i32, i32
  }
  func.func @transform_9(%arg0: i32) -> (i32, i32) {
    %c0_i32 = arith.constant 0 : i32
    %c0_i32_0 = arith.constant 0 : i32
    return %arg0, %c0_i32 : i32, i32
  }
}

</mosaic_0001>

<bundles_post_ra>
// kernel: tpu_custom_call.1
= control target key start
LH: loop header
LB: loop body
LE: loop exit
PB: predicated region body
PF: predicated region fallthrough
CT: control target
= control target key end

     0   :  { %14 = vsyncpa [#allocation3], 0  ;;  %s1265_s0 = inlined_call_operand.vmem [shape: f32[64,16], index: 0, kind: input, shape index: {}]   ;;  %s1266_s1 = inlined_call_operand.vmem [shape: f32[16,128], index: 1, kind: input, shape index: {}]   ;;  %s1267_s2 = inlined_call_operand.vmem [shape: f32[1,128], index: 2, kind: input, shape index: {}]   ;;  %s1268_s3 = inlined_call_operand.hbm [shape: f32[128,128], index: 3, kind: input, shape index: {}]   ;;  %s1269_s4 = inlined_call_operand.vmem [shape: f32[1,128], index: 4, kind: input, shape index: {}]   ;;  %s1270_s5 = inlined_call_operand.hbm [shape: f32[128,128], index: 5, kind: input, shape index: {}]   ;;  %s1271_s6 = inlined_call_operand.vmem [shape: f32[1,128], index: 6, kind: input, shape index: {}]   ;;  %s1272_s7 = inlined_call_operand.hbm [shape: f32[128,128], index: 7, kind: input, shape index: {}]   ;;  %s1273_s8 = inlined_call_operand.vmem [shape: f32[1,128], index: 8, kind: input, shape index: {}]   ;;  %s1274_s9 = inlined_call_operand.vmem [shape: f32[64,1], index: 9, kind: output, shape index: {}]  }
   0x1   :  { %15 = vsyncpa [#allocation5], 0  ;;  %s1076_s30 = smov [#allocation4]   ;;  %s1077_s11 = smov [#allocation2]  }
   0x2   :  { %s41_s10 = sshll.u32 %s1076_s30, 4  ;;  %s27_s12 = sshll.u32 %s1077_s11, 4  ;;  %s42_s10 = int_to_ptr.vmem [resolvable:$true] %s41_s10  ;;  %s1131_s12 = int_to_ptr.vmem [resolvable:$true] %s27_s12 }
   0x3   :  { %s1006_s15 = scalar_lea.hbm %s1270_s5, 2048 }
   0x4   :  { %p1007_p0 = scmp.ne.s32.totalorder %s1270_s5, %s1006_s15  ;;  %p1010_p1 = scmp.lt.u32.totalorder %s1006_s15, %s1270_s5 }
   0x6   :  { %p1012_p2 = pnand %p1010_p1, %p1007_p0 }
   0x8   :  { %1015 = shalt.err (!%p1012_p2)
}
   0x9   :  { %s1016_s20 = scalar_lea.vmem %s42_s10, 2048  ;;  %p1021_p4 = scmp.lt.s32.totalorder %s42_s10, %s42_s10 }
   0xa   :  { %p1017_p3 = scmp.ne.s32.totalorder %s42_s10, %s1016_s20  ;;  %p1022_p5 = scmp.lt.s32.totalorder %s1016_s20, %s1016_s20 }
   0xc   :  { %p1023_p6 = por %p1022_p5, %p1021_p4 }
   0xe   :  { %p1024_p7 = pnand %p1023_p6, %p1017_p3 }
  0x10   :  { %1027 = shalt.err (!%p1024_p7)
}
  0x11   :  { %s1078_s21 = smov 128   ;;  %s1079_s22 = smov 8  }
  0x12   :  { %47 = dma.hbm_to_vmem [thread:$0]  %s1270_s5, 2048, %s42_s10, [#allocation5], %s1078_s21, %s1078_s21, %s1079_s22  }
  0x13   :  { %s1028_s27 = scalar_lea.hbm %s1268_s3, 2048 }
  0x14   :  { %p1029_p8 = scmp.ne.s32.totalorder %s1268_s3, %s1028_s27  ;;  %p1032_p9 = scmp.lt.u32.totalorder %s1028_s27, %s1268_s3 }
  0x16   :  { %p1034_p10 = pnand %p1032_p9, %p1029_p8 }
  0x18   :  { %1037 = shalt.err (!%p1034_p10)
}
  0x19   :  { %s1038_s13 = scalar_lea.vmem %s1131_s12, 2048  ;;  %p1043_p12 = scmp.lt.s32.totalorder %s1131_s12, %s1131_s12 }
  0x1a   :  { %p1039_p11 = scmp.ne.s32.totalorder %s1131_s12, %s1038_s13  ;;  %p1044_p13 = scmp.lt.s32.totalorder %s1038_s13, %s1038_s13 }
  0x1c   :  { %p1045_p0 = por %p1044_p13, %p1043_p12 }
  0x1e   :  { %p1046_p1 = pnand %p1045_p0, %p1039_p11 }
  0x20   :  { %1049 = shalt.err (!%p1046_p1)
}
  0x21   :  { %33 = dma.hbm_to_vmem [thread:$0]  %s1268_s3, 2048, %s1131_s12, [#allocation3], %s1078_s21, %s1078_s21, %s1079_s22  }
  0x22   :  { %s1080_s14 = smov [#allocation6]   ;;  %s1050_s18 = scalar_lea.hbm %s1272_s7, 2048 }
  0x23   :  { %s55_s15 = sshll.u32 %s1080_s14, 4  ;;  %p1051_p2 = scmp.ne.s32.totalorder %s1272_s7, %s1050_s18  ;;  %s56_s15 = int_to_ptr.vmem [resolvable:$true] %s55_s15 }
  0x24   :  { %p1054_p3 = scmp.lt.u32.totalorder %s1050_s18, %s1272_s7 }
  0x26   :  { %p1056_p4 = pnand %p1054_p3, %p1051_p2 }
  0x28   :  { %1059 = shalt.err (!%p1056_p4)
}
  0x29   :  { %s1060_s25 = scalar_lea.vmem %s56_s15, 2048  ;;  %p1065_p6 = scmp.lt.s32.totalorder %s56_s15, %s56_s15 }
  0x2a   :  { %p1061_p5 = scmp.ne.s32.totalorder %s56_s15, %s1060_s25  ;;  %p1066_p7 = scmp.lt.s32.totalorder %s1060_s25, %s1060_s25 }
  0x2c   :  { %p1067_p8 = por %p1066_p7, %p1065_p6 }
  0x2e   :  { %p1068_p9 = pnand %p1067_p8, %p1061_p5 }
  0x30   :  { %1071 = shalt.err (!%p1068_p9)
}
  0x31   :  { %61 = dma.hbm_to_vmem [thread:$0]  %s1272_s7, 2048, %s56_s15, [#allocation5], %s1078_s21, %s1078_s21, %s1079_s22  }
  0x32   :  { %1072 = dma.done.wait [#allocation3], 2048  }
  0x33   :  { %1073 = vsyncadd [#allocation3], 4294965248 }
  0x34   :  { %1074 = dma.done.wait [#allocation5], 4096  }
  0x35   :  { %1075 = vsyncadd [#allocation5], 4294963200  ;;  %vm90_vm0 = vcmask 130048   ;;  %v81_v0 = vld [vmem:[%s1266_s1] sm:$0xff]  ;;  %v82_v1 = vld [vmem:[%s1266_s1 + $0x8] sm:$0xff]  ;;  %vm628_vm1 = vcmask 7168  }
  0x36   :  { %v73_v2 = vld [vmem:[%s1265_s0] sm:$0xff]  ;;  %v885_v3 = vpack.c.bf16 %v82_v1, %v81_v0  ;;  %v229_v5 = vld [vmem:[#allocation2 + $0x8] sm:$0xff]  ;;  %v230_v8 = vld [vmem:[#allocation2 + $0x10] sm:$0xff] }
  0x37   :  { %741 = vmatprep.mubr.msk.f32.mxu0 %vm90_vm0, %v73_v2  ;;  %v228_v4 = vld [vmem:[#allocation2] sm:$0xff]  ;;  %v74_v6 = vld [vmem:[%s1265_s0 + $0x8] sm:$0xff]  ;;  %v231_v9 = vld [vmem:[#allocation2 + $0x18] sm:$0xff] }
  0x38   :  { %886 = vmatprep.subr.bf16.mxu0 %v885_v3  ;;  %v889_v7 = vpack.c.bf16 %v229_v5, %v228_v4  ;;  %v75_v10 = vld [vmem:[%s1265_s0 + $0x10] sm:$0xff]  ;;  %v893_v11 = vpack.c.bf16 %v231_v9, %v230_v8  ;;  %v232_v12 = vld [vmem:[#allocation2 + $0x20] sm:$0xff]  ;;  %v233_v13 = vld [vmem:[#allocation2 + $0x28] sm:$0xff] }
  0x39   :  { %888 = vmatpush3.bf16.msra.mxu0 %v885_v3  ;;  %v76_v14 = vld [vmem:[%s1265_s0 + $0x18] sm:$0xff]  ;;  %v897_v15 = vpack.c.bf16 %v233_v13, %v232_v12  ;;  %v77_v16 = vld [vmem:[%s1265_s0 + $0x20] sm:$0xff]  ;;  %v234_v17 = vld [vmem:[#allocation2 + $0x30] sm:$0xff] }
  0x3a   :  { %890 = vmatprep.subr.bf16.mxu1 %v889_v7  ;;  %v235_v18 = vld [vmem:[#allocation2 + $0x38] sm:$0xff]  ;;  %v78_v19 = vld [vmem:[%s1265_s0 + $0x28] sm:$0xff]  ;;  %v79_v21 = vld [vmem:[%s1265_s0 + $0x30] sm:$0xff] }
  0x3b   :  { %892 = vmatpush3.bf16.msra.mxu1 %v889_v7  ;;  %v901_v20 = vpack.c.bf16 %v235_v18, %v234_v17  ;;  %v236_v22 = vld [vmem:[#allocation2 + $0x40] sm:$0xff]  ;;  %v237_v23 = vld [vmem:[#allocation2 + $0x48] sm:$0xff]  ;;  %v80_v24 = vld [vmem:[%s1265_s0 + $0x38] sm:$0xff] }
  0x3c   :  { %742 = vmatmul.mubr.msk.f32.vlgmr.msra.gmra.mrb[0].mxu0 %vm90_vm0, %v74_v6  ;;  %894 = vmatprep.subr.bf16.mxu1 %v893_v11  ;;  %v905_v25 = vpack.c.bf16 %v237_v23, %v236_v22  ;;  %v238_v26 = vld [vmem:[#allocation2 + $0x50] sm:$0xff]  ;;  %v239_v27 = vld [vmem:[#allocation2 + $0x58] sm:$0xff]  ;;  %v240_v29 = vld [vmem:[#allocation2 + $0x60] sm:$0xff] }
  0x3d   :  { %744 = vmatprep.mubr.msk.f32.mxu0 %vm90_vm0, %v75_v10  ;;  %v909_v28 = vpack.c.bf16 %v239_v27, %v238_v26  ;;  %v241_v30 = vld [vmem:[#allocation2 + $0x68] sm:$0xff]  ;;  %v242_v32 = vld [vmem:[#allocation2 + $0x70] sm:$0xff]  ;;  %v243_v33 = vld [vmem:[#allocation2 + $0x78] sm:$0xff] }
  0x3e   :  { %v913_v31 = vpack.c.bf16 %v241_v30, %v240_v29  ;;  %v917_v34 = vpack.c.bf16 %v243_v33, %v242_v32  ;;  %v364_v35 = vld [vmem:[#allocation4] sm:$0xff]  ;;  %v365_v36 = vld [vmem:[#allocation4 + $0x8] sm:$0xff]  ;;  %v366_v37 = vld [vmem:[#allocation4 + $0x10] sm:$0xff] }
  0x3f   :  { %896 = vmatpush3.bf16.msra.mxu1 %v893_v11  ;;  %v921_v38 = vpack.c.bf16 %v365_v36, %v364_v35  ;;  %v367_v39 = vld [vmem:[#allocation4 + $0x18] sm:$0xff]  ;;  %v368_v41 = vld [vmem:[#allocation4 + $0x20] sm:$0xff]  ;;  %v369_v42 = vld [vmem:[#allocation4 + $0x28] sm:$0xff] }
  0x40   :  { %745 = vmatmul.mubr.msk.f32.gmra.mrb[2].mxu0 %vm90_vm0, %v76_v14  ;;  %898 = vmatprep.subr.bf16.mxu1 %v897_v15  ;;  %v925_v40 = vpack.c.bf16 %v367_v39, %v366_v37  ;;  %v929_v43 = vpack.c.bf16 %v369_v42, %v368_v41  ;;  %v370_v44 = vld [vmem:[#allocation4 + $0x30] sm:$0xff]  ;;  %v371_v45 = vld [vmem:[#allocation4 + $0x38] sm:$0xff]  ;;  %v372_v47 = vld [vmem:[#allocation4 + $0x40] sm:$0xff] }
  0x41   :  { %747 = vmatprep.mubr.msk.f32.mxu0 %vm90_vm0, %v77_v16  ;;  %922 = vmatprep.subr.bf16.mxu0 %v921_v38  ;;  %v933_v46 = vpack.c.bf16 %v371_v45, %v370_v44  ;;  %v373_v48 = vld [vmem:[#allocation4 + $0x48] sm:$0xff]  ;;  %v374_v50 = vld [vmem:[#allocation4 + $0x50] sm:$0xff]  ;;  %v375_v51 = vld [vmem:[#allocation4 + $0x58] sm:$0xff] }
  0x42   :  { %924 = vmatpush3.bf16.msra.mxu0 %v921_v38  ;;  %v937_v49 = vpack.c.bf16 %v373_v48, %v372_v47  ;;  %v941_v52 = vpack.c.bf16 %v375_v51, %v374_v50  ;;  %v376_v53 = vld [vmem:[#allocation4 + $0x60] sm:$0xff]  ;;  %v377_v54 = vld [vmem:[#allocation4 + $0x68] sm:$0xff]  ;;  %v378_v17 = vld [vmem:[#allocation4 + $0x70] sm:$0xff] }
  0x43   :  { %900 = vmatpush3.bf16.msra.mxu1 %v897_v15  ;;  %926 = vmatprep.subr.bf16.mxu0 %v925_v40  ;;  %v945_v55 = vpack.c.bf16 %v377_v54, %v376_v53  ;;  %v643_v56 = vld [vmem:[%s1267_s2] ss:$0 sm:$0xff]  ;;  %v379_v18 = vld [vmem:[#allocation4 + $0x78] sm:$0xff]  ;;  %v502_v22 = vld [vmem:[#allocation6 + $0x10] sm:$0xff] }
  0x44   :  { %748 = vmatmul.mubr.msk.f32.gmra.mrb[4].mxu0 %vm90_vm0, %v78_v19  ;;  %902 = vmatprep.subr.bf16.mxu1 %v901_v20  ;;  %v949_v19 = vpack.c.bf16 %v379_v18, %v378_v17  ;;  %v504_v26 = vld [vmem:[#allocation6 + $0x20] sm:$0xff]  ;;  %v505_v27 = vld [vmem:[#allocation6 + $0x28] sm:$0xff]  ;;  %v506_v29 = vld [vmem:[#allocation6 + $0x30] sm:$0xff] }
  0x45   :  { %750 = vmatprep.mubr.msk.f32.mxu0 %vm90_vm0, %v79_v21  ;;  %v501_v21 = vld [vmem:[#allocation6 + $0x8] sm:$0xff]  ;;  %v507_v30 = vld [vmem:[#allocation6 + $0x38] sm:$0xff]  ;;  %v508_v32 = vld [vmem:[#allocation6 + $0x40] sm:$0xff] }
  0x46   :  { %928 = vmatpush3.bf16.msra.mxu0 %v925_v40  ;;  %v509_v33 = vld [vmem:[#allocation6 + $0x48] sm:$0xff]  ;;  %v510_v35 = vld [vmem:[#allocation6 + $0x50] sm:$0xff]  ;;  %v511_v36 = vld [vmem:[#allocation6 + $0x58] sm:$0xff] }
  0x47   :  { %904 = vmatpush3.bf16.msra.mxu1 %v901_v20  ;;  %930 = vmatprep.subr.bf16.mxu0 %v929_v43  ;;  %v500_v20 = vld [vmem:[#allocation6] sm:$0xff]  ;;  %v973_v37 = vpack.c.bf16 %v511_v36, %v510_v35  ;;  %v513_v39 = vld [vmem:[#allocation6 + $0x68] sm:$0xff] }
  0x48   :  { %751 = vmatmul.mubr.msk.f32.gmra.mrb[6].mxu0 %vm90_vm0, %v80_v24  ;;  %906 = vmatprep.subr.bf16.mxu1 %v905_v25  ;;  %v953_v23 = vpack.c.bf16 %v501_v21, %v500_v20  ;;  %v503_v24 = vld [vmem:[#allocation6 + $0x18] sm:$0xff]  ;;  %v512_v38 = vld [vmem:[#allocation6 + $0x60] sm:$0xff] }
  0x49   :  { %v977_v40 = vpack.c.bf16 %v513_v39, %v512_v38  ;;  %v652_v41 = vld [vmem:[%s1269_s4] ss:$0 sm:$0xff] }
  0x4a   :  { %932 = vmatpush3.bf16.msra.mxu0 %v929_v43 }
  0x4b   :  { %908 = vmatpush3.bf16.msra.mxu1 %v905_v25  ;;  %934 = vmatprep.subr.bf16.mxu0 %v933_v46  ;;  %v957_v25 = vpack.c.bf16 %v503_v24, %v502_v22 }
  0x4c   :  { %910 = vmatprep.subr.bf16.mxu1 %v909_v28 }
  0x4e   :  { %936 = vmatpush3.bf16.msra.mxu0 %v933_v46 }
  0x4f   :  { %912 = vmatpush3.bf16.msra.mxu1 %v909_v28  ;;  %938 = vmatprep.subr.bf16.mxu0 %v937_v49  ;;  %v961_v28 = vpack.c.bf16 %v505_v27, %v504_v26 }
  0x50   :  { %914 = vmatprep.subr.bf16.mxu1 %v913_v31 }
  0x52   :  { %940 = vmatpush3.bf16.msra.mxu0 %v937_v49 }
  0x53   :  { %916 = vmatpush3.bf16.msra.mxu1 %v913_v31  ;;  %942 = vmatprep.subr.bf16.mxu0 %v941_v52  ;;  %v965_v31 = vpack.c.bf16 %v507_v30, %v506_v29  ;;  %v654_v30 = vld [vmem:[%s1273_s8] ss:$0 sm:$0xff] }
  0x54   :  { %918 = vmatprep.subr.bf16.mxu1 %v917_v34 }
  0x56   :  { %944 = vmatpush3.bf16.msra.mxu0 %v941_v52 }
  0x57   :  { %920 = vmatpush3.bf16.msra.mxu1 %v917_v34  ;;  %946 = vmatprep.subr.bf16.mxu0 %v945_v55  ;;  %v969_v34 = vpack.c.bf16 %v509_v33, %v508_v32 }
  0x58   :  { %985 = vmatprep.subr.bf16.mxu1 %v953_v23 }
  0x5a   :  { %948 = vmatpush3.bf16.msra.mxu0 %v945_v55 }
  0x5b   :  { %950 = vmatprep.subr.bf16.mxu0 %v949_v19 }
  0x5e   :  { %952 = vmatpush3.bf16.msra.mxu0 %v949_v19 }
  0x5f   :  { %954 = vmatprep.subr.bf16.mxu0 %v953_v23 }
 0x10f   :  { %v743_v57 = vpop.f32.mrb[0].mxu0 }
 0x110   :  { %v187_v58 = vadd.f32 %v743_v57, %v643_v56  ;;  %v181_v59 = vpop.f32.mrb[1].mxu0 }
 0x111   :  { %v182_v60 = vadd.f32 %v643_v56, %v181_v59 }
 0x112   :  { %v221_v63 = vmax.f32 %v187_v58, 0.0 }
 0x113   :  { %v746_v61 = vpop.f32.mrb[2].mxu0  ;;  %v220_v62 = vmax.f32 %v182_v60, 0.0 }
 0x114   :  { %v197_v0 = vadd.f32 %v746_v61, %v643_v56  ;;  %v191_v1 = vpop.f32.mrb[3].mxu0 }
 0x115   :  { %v192_v2 = vadd.f32 %v643_v56, %v191_v1  ;;  %785 = vmatprep.mubr.f32.mxu1 %v220_v62 }
 0x116   :  { %786 = vmatmul.mubr.f32.vlgmr.msra.gmra.mrb[0].mxu1 %v221_v63  ;;  %v223_v5 = vmax.f32 %v197_v0, 0.0 }
 0x117   :  { %v222_v3 = vmax.f32 %v192_v2, 0.0  ;;  %v749_v4 = vpop.f32.mrb[4].mxu0  ;;  %993 = vmatpush3.bf16.msra.mxu1 %v953_v23  ;;  %v514_v2 = vld [vmem:[#allocation6 + $0x70] sm:$0xff] }
 0x118   :  { %v207_v6 = vadd.f32 %v749_v4, %v643_v56  ;;  %v201_v7 = vpop.f32.mrb[5].mxu0  ;;  %986 = vmatprep.subr.bf16.mxu1 %v957_v25 }
 0x119   :  { %v202_v8 = vadd.f32 %v643_v56, %v201_v7  ;;  %788 = vmatprep.mubr.f32.mxu1 %v222_v3  ;;  %v515_v3 = vld [vmem:[#allocation6 + $0x78] sm:$0xff] }
 0x11a   :  { %789 = vmatmul.mubr.f32.gmra.mrb[2].mxu1 %v223_v5  ;;  %v225_v11 = vmax.f32 %v207_v6, 0.0  ;;  %v981_v4 = vpack.c.bf16 %v515_v3, %v514_v2  ;;  %v653_v5 = vld [vmem:[%s1271_s6] ss:$0 sm:$0xff] }
 0x11b   :  { %v224_v9 = vmax.f32 %v202_v8, 0.0  ;;  %v752_v10 = vpop.f32.mrb[6].mxu0  ;;  %994 = vmatpush3.bf16.msra.mxu1 %v957_v25 }
 0x11c   :  { %v217_v12 = vadd.f32 %v752_v10, %v643_v56  ;;  %v211_v13 = vpop.f32.mrb[7].mxu0  ;;  %987 = vmatprep.subr.bf16.mxu1 %v961_v28 }
 0x11d   :  { %v212_v14 = vadd.f32 %v643_v56, %v211_v13  ;;  %791 = vmatprep.mubr.f32.mxu1 %v224_v9 }
 0x11e   :  { %792 = vmatmul.mubr.f32.gmra.mrb[4].mxu1 %v225_v11  ;;  %v227_v16 = vmax.f32 %v217_v12, 0.0 }
 0x11f   :  { %v226_v15 = vmax.f32 %v212_v14, 0.0  ;;  %995 = vmatpush3.bf16.msra.mxu1 %v961_v28 }
 0x120   :  { %988 = vmatprep.subr.bf16.mxu1 %v965_v31 }
 0x121   :  { %794 = vmatprep.mubr.f32.mxu1 %v226_v15 }
 0x122   :  { %795 = vmatmul.mubr.f32.gmra.mrb[6].mxu1 %v227_v16 }
 0x123   :  { %996 = vmatpush3.bf16.msra.mxu1 %v965_v31 }
 0x124   :  { %989 = vmatprep.subr.bf16.mxu1 %v969_v34 }
 0x127   :  { %997 = vmatpush3.bf16.msra.mxu1 %v969_v34 }
 0x128   :  { %990 = vmatprep.subr.bf16.mxu1 %v973_v37 }
 0x12b   :  { %998 = vmatpush3.bf16.msra.mxu1 %v973_v37 }
 0x12c   :  { %991 = vmatprep.subr.bf16.mxu1 %v977_v40 }
 0x12f   :  { %999 = vmatpush3.bf16.msra.mxu1 %v977_v40 }
 0x130   :  { %992 = vmatprep.subr.bf16.mxu1 %v981_v4 }
 0x133   :  { %1000 = vmatpush3.bf16.msra.mxu1 %v981_v4 }
 0x1e9   :  { %v787_v42 = vpop.f32.mrb[0].mxu1 }
 0x1ea   :  { %v323_v43 = vadd.f32 %v787_v42, %v652_v41  ;;  %v317_v44 = vpop.f32.mrb[1].mxu1 }
 0x1eb   :  { %v318_v45 = vadd.f32 %v652_v41, %v317_v44 }
 0x1ec   :  { %v357_v48 = vmax.f32 %v323_v43, 0.0 }
 0x1ed   :  { %v356_v46 = vmax.f32 %v318_v45, 0.0  ;;  %v790_v47 = vpop.f32.mrb[2].mxu1 }
 0x1ee   :  { %v333_v49 = vadd.f32 %v790_v47, %v652_v41  ;;  %v327_v50 = vpop.f32.mrb[3].mxu1 }
 0x1ef   :  { %v328_v51 = vadd.f32 %v652_v41, %v327_v50  ;;  %829 = vmatprep.mubr.f32.mxu0 %v356_v46 }
 0x1f0   :  { %830 = vmatmul.mubr.f32.vlgmr.msra.gmra.mrb[8].mxu0 %v357_v48  ;;  %v359_v54 = vmax.f32 %v333_v49, 0.0 }
 0x1f1   :  { %v358_v52 = vmax.f32 %v328_v51, 0.0  ;;  %v793_v53 = vpop.f32.mrb[4].mxu1  ;;  %956 = vmatpush3.bf16.msra.mxu0 %v953_v23 }
 0x1f2   :  { %v343_v55 = vadd.f32 %v793_v53, %v652_v41  ;;  %v337_v56 = vpop.f32.mrb[5].mxu1  ;;  %958 = vmatprep.subr.bf16.mxu0 %v957_v25 }
 0x1f3   :  { %v338_v57 = vadd.f32 %v652_v41, %v337_v56  ;;  %832 = vmatprep.mubr.f32.mxu0 %v358_v52 }
 0x1f4   :  { %833 = vmatmul.mubr.f32.gmra.mrb[10].mxu0 %v359_v54  ;;  %v361_v60 = vmax.f32 %v343_v55, 0.0 }
 0x1f5   :  { %v360_v58 = vmax.f32 %v338_v57, 0.0  ;;  %v796_v59 = vpop.f32.mrb[6].mxu1  ;;  %960 = vmatpush3.bf16.msra.mxu0 %v957_v25 }
 0x1f6   :  { %v353_v61 = vadd.f32 %v796_v59, %v652_v41  ;;  %v347_v62 = vpop.f32.mrb[7].mxu1  ;;  %962 = vmatprep.subr.bf16.mxu0 %v961_v28 }
 0x1f7   :  { %v348_v63 = vadd.f32 %v652_v41, %v347_v62  ;;  %835 = vmatprep.mubr.f32.mxu0 %v360_v58 }
 0x1f8   :  { %836 = vmatmul.mubr.f32.gmra.mrb[12].mxu0 %v361_v60  ;;  %v363_v1 = vmax.f32 %v353_v61, 0.0 }
 0x1f9   :  { %v362_v0 = vmax.f32 %v348_v63, 0.0  ;;  %964 = vmatpush3.bf16.msra.mxu0 %v961_v28 }
 0x1fa   :  { %966 = vmatprep.subr.bf16.mxu0 %v965_v31 }
 0x1fb   :  { %838 = vmatprep.mubr.f32.mxu0 %v362_v0 }
 0x1fc   :  { %839 = vmatmul.mubr.f32.gmra.mrb[14].mxu0 %v363_v1 }
 0x1fd   :  { %968 = vmatpush3.bf16.msra.mxu0 %v965_v31 }
 0x1fe   :  { %970 = vmatprep.subr.bf16.mxu0 %v969_v34 }
 0x201   :  { %972 = vmatpush3.bf16.msra.mxu0 %v969_v34 }
 0x202   :  { %974 = vmatprep.subr.bf16.mxu0 %v973_v37 }
 0x205   :  { %976 = vmatpush3.bf16.msra.mxu0 %v973_v37 }
 0x206   :  { %978 = vmatprep.subr.bf16.mxu0 %v977_v40 }
 0x209   :  { %980 = vmatpush3.bf16.msra.mxu0 %v977_v40 }
 0x20a   :  { %982 = vmatprep.subr.bf16.mxu0 %v981_v4 }
 0x20d   :  { %984 = vmatpush3.bf16.msra.mxu0 %v981_v4 }
 0x2c3   :  { %v831_v6 = vpop.f32.mrb[8].mxu0 }
 0x2c4   :  { %v459_v7 = vadd.f32 %v831_v6, %v653_v5  ;;  %v453_v8 = vpop.f32.mrb[9].mxu0 }
 0x2c5   :  { %v454_v9 = vadd.f32 %v653_v5, %v453_v8 }
 0x2c6   :  { %v493_v12 = vmax.f32 %v459_v7, 0.0 }
 0x2c7   :  { %v492_v10 = vmax.f32 %v454_v9, 0.0  ;;  %v834_v11 = vpop.f32.mrb[10].mxu0 }
 0x2c8   :  { %v469_v13 = vadd.f32 %v834_v11, %v653_v5  ;;  %v463_v14 = vpop.f32.mrb[11].mxu0 }
 0x2c9   :  { %v464_v15 = vadd.f32 %v653_v5, %v463_v14  ;;  %873 = vmatprep.mubr.f32.mxu0 %v492_v10 }
 0x2ca   :  { %874 = vmatmul.mubr.f32.vlgmr.msra.gmra.mrb[16].mxu0 %v493_v12  ;;  %v495_v18 = vmax.f32 %v469_v13, 0.0 }
 0x2cb   :  { %v494_v16 = vmax.f32 %v464_v15, 0.0  ;;  %v837_v17 = vpop.f32.mrb[12].mxu0 }
 0x2cc   :  { %v479_v19 = vadd.f32 %v837_v17, %v653_v5  ;;  %v473_v20 = vpop.f32.mrb[13].mxu0 }
 0x2cd   :  { %v474_v21 = vadd.f32 %v653_v5, %v473_v20  ;;  %876 = vmatprep.mubr.f32.mxu1 %v494_v16 }
 0x2ce   :  { %877 = vmatmul.mubr.f32.vlgmr.msra.gmra.mrb[8].mxu1 %v495_v18  ;;  %v497_v24 = vmax.f32 %v479_v19, 0.0 }
 0x2cf   :  { %v496_v22 = vmax.f32 %v474_v21, 0.0  ;;  %v840_v23 = vpop.f32.mrb[14].mxu0 }
 0x2d0   :  { %v489_v25 = vadd.f32 %v840_v23, %v653_v5  ;;  %v483_v26 = vpop.f32.mrb[15].mxu0 }
 0x2d1   :  { %v484_v27 = vadd.f32 %v653_v5, %v483_v26  ;;  %879 = vmatprep.mubr.f32.mxu1 %v496_v22 }
 0x2d2   :  { %880 = vmatmul.mubr.f32.gmra.mrb[10].mxu1 %v497_v24  ;;  %v499_v29 = vmax.f32 %v489_v25, 0.0 }
 0x2d3   :  { %v498_v28 = vmax.f32 %v484_v27, 0.0 }
 0x2d5   :  { %882 = vmatprep.mubr.f32.mxu1 %v498_v28 }
 0x2d6   :  { %883 = vmatmul.mubr.f32.gmra.mrb[12].mxu1 %v499_v29 }
 0x39d   :  { %v875_v31 = vpop.f32.mrb[16].mxu0 }
 0x39e   :  { %v595_v32 = vadd.f32 %v875_v31, %v654_v30  ;;  %v589_v33 = vpop.f32.mrb[17].mxu0 }
 0x39f   :  { %v590_v34 = vadd.f32 %v654_v30, %v589_v33 }
 0x3a0   :  { %630 = vst.msk [vmem:[%s1274_s9 + $0x8] sm:$0xff] %vm628_vm1, %v595_v32 }
 0x3a1   :  { %629 = vst.msk [vmem:[%s1274_s9] sm:$0xff] %vm628_vm1, %v590_v34  ;;  %v878_v35 = vpop.f32.mrb[8].mxu1 }
 0x3a2   :  { %v605_v36 = vadd.f32 %v878_v35, %v654_v30  ;;  %v599_v37 = vpop.f32.mrb[9].mxu1 }
 0x3a3   :  { %v600_v38 = vadd.f32 %v654_v30, %v599_v37 }
 0x3a4   :  { %632 = vst.msk [vmem:[%s1274_s9 + $0x18] sm:$0xff] %vm628_vm1, %v605_v36 }
 0x3a5   :  { %631 = vst.msk [vmem:[%s1274_s9 + $0x10] sm:$0xff] %vm628_vm1, %v600_v38  ;;  %v881_v39 = vpop.f32.mrb[10].mxu1 }
 0x3a6   :  { %v615_v40 = vadd.f32 %v881_v39, %v654_v30  ;;  %v609_v41 = vpop.f32.mrb[11].mxu1 }
 0x3a7   :  { %v610_v42 = vadd.f32 %v654_v30, %v609_v41 }
 0x3a8   :  { %634 = vst.msk [vmem:[%s1274_s9 + $0x28] sm:$0xff] %vm628_vm1, %v615_v40 }
 0x3a9   :  { %633 = vst.msk [vmem:[%s1274_s9 + $0x20] sm:$0xff] %vm628_vm1, %v610_v42  ;;  %v884_v43 = vpop.f32.mrb[12].mxu1 }
 0x3aa   :  { %v625_v44 = vadd.f32 %v884_v43, %v654_v30  ;;  %v619_v45 = vpop.f32.mrb[13].mxu1 }
 0x3ab   :  { %v620_v46 = vadd.f32 %v654_v30, %v619_v45 }
 0x3ac   :  { %636 = vst.msk [vmem:[%s1274_s9 + $0x38] sm:$0xff] %vm628_vm1, %v625_v44 }
 0x3ad   :  { %635 = vst.msk [vmem:[%s1274_s9 + $0x30] sm:$0xff] %vm628_vm1, %v620_v46 }
 0x3ae   :  { %641 = vsyncpa [#allocation3], 1 }
 0x3af   :  { %642 = vsyncpa [#allocation5], 1 }

</bundles_post_ra>
